<compile_context>
chip_gen: v6e
topology: v6e:2x2x1
jax: 0.10.0
libtpu: 0.0.40
codegen_flags: <defaults>
</compile_context>

<pallas_src>
import functools

import jax
import jax.numpy as jnp
from jax import lax
from jax.experimental import pallas as pl
from jax.experimental.pallas import tpu as pltpu


def cbam_kernel(x_ref, w1_ref, b1_ref, w2_ref, b2_ref, wc_ref, bc_ref, o_ref,
                *, H, W):
    C, HW = x_ref.shape
    inv_hw = 1.0 / float(HW)
    inv_c = 1.0 / float(C)

    x = x_ref[...]                                   # (C, HW), native dtype

    # ---------------- channel attention ----------------
    # Single-pass pooling over the flattened lane axis; f32 accumulation.
    xf = x.astype(jnp.float32)
    pooled = jnp.concatenate(
        [jnp.sum(xf, axis=1, keepdims=True) * inv_hw,    # avg pool  (C, 1)
         jnp.max(xf, axis=1, keepdims=True)],            # max pool  (C, 1)
        axis=1)                                          # -> (C, 2)

    w1 = w1_ref[...].astype(jnp.float32)   # (Cr, C)
    b1 = b1_ref[...].astype(jnp.float32)   # (Cr, 1)
    w2 = w2_ref[...].astype(jnp.float32)   # (C, Cr)
    b2 = b2_ref[...].astype(jnp.float32)   # (C, 1)

    # Fused MLP over both pooled branches (one dot per layer).
    h = jnp.maximum(
        jnp.dot(w1, pooled, preferred_element_type=jnp.float32) + b1, 0.0)  # (Cr, 2)
    y = jnp.dot(w2, h, preferred_element_type=jnp.float32) + b2             # (C, 2)
    ch = jax.nn.sigmoid(jnp.sum(y, axis=1, keepdims=True))                  # (C, 1)

    x_ch = x * ch.astype(x.dtype)                    # channel-weighted features (C, HW)

    # ---------------- spatial attention ----------------
    # Mean / max over channels (sublane-direction reduce), f32 accumulation.
    sp_avg = jnp.sum(x_ch.astype(jnp.float32), axis=0, keepdims=True) * inv_c  # (1, HW)
    sp_max = jnp.max(x_ch, axis=0, keepdims=True).astype(jnp.float32)          # (1, HW)

    # Boundary masks for the implicit zero padding of the 3x3 conv, built on
    # the flat index (row = f // W, col = f % W).
    fidx = lax.broadcasted_iota(jnp.int32, (1, HW), 1)
    col = fidx % W
    not_first_col = col > 0            # valid when dx == -1
    not_last_col = col < (W - 1)       # valid when dx == +1
    not_first_row = fidx >= W          # valid when dy == -1
    not_last_row = fidx < (H - 1) * W  # valid when dy == +1

    acc = jnp.zeros((1, HW), jnp.float32) + bc_ref[0, 0]
    # 3x3 conv over the 2-channel (avg, max) map, padding=1.  Each tap is one
    # flat roll by dy*W + dx (XLU) plus an edge mask.
    for dy in (-1, 0, 1):
        for dx in (-1, 0, 1):
            k = (dy + 1) * 3 + (dx + 1)
            w_a = wc_ref[0, k]
            w_m = wc_ref[1, k]
            s = dy * W + dx
            if s == 0:
                a_sh, m_sh = sp_avg, sp_max
            else:
                sh = (-s) % HW                      # non-negative roll amount
                a_sh = pltpu.roll(sp_avg, sh, 1)
                m_sh = pltpu.roll(sp_max, sh, 1)
            contrib = w_a * a_sh + w_m * m_sh
            valid = None
            if dx == -1:
                valid = not_first_col
            elif dx == 1:
                valid = not_last_col
            if dy == -1:
                valid = not_first_row if valid is None else (valid & not_first_row)
            elif dy == 1:
                valid = not_last_row if valid is None else (valid & not_last_row)
            if valid is not None:
                contrib = jnp.where(valid, contrib, 0.0)
            acc = acc + contrib

    sp = jax.nn.sigmoid(acc)                         # (1, HW)
    # Single lane-dense store of the final result.
    o_ref[...] = (x_ch * sp.astype(x.dtype)).astype(o_ref.dtype)


def cbam_pallas(x, w1, b1, w2, b2, wc, bc):
    B, C, H, W = x.shape
    HW = H * W
    Cr = w1.shape[0]
    x_flat = x.reshape(B, C, HW)                     # lane-dense layout (free reshape)

    kernel = functools.partial(cbam_kernel, H=H, W=W)
    out_flat = pl.pallas_call(
        kernel,
        out_shape=jax.ShapeDtypeStruct((B, C, HW), x.dtype),
        grid=(B,),
        in_specs=[
            pl.BlockSpec((None, C, HW), lambda b: (b, 0, 0)),        # x (flattened)
            pl.BlockSpec((Cr, C), lambda b: (0, 0)),                 # fc1 weight
            pl.BlockSpec((Cr, 1), lambda b: (0, 0)),                 # fc1 bias
            pl.BlockSpec((C, Cr), lambda b: (0, 0)),                 # fc2 weight
            pl.BlockSpec((C, 1), lambda b: (0, 0)),                  # fc2 bias
            pl.BlockSpec(memory_space=pltpu.MemorySpace.SMEM),       # conv3x3 weight (2, 9)
            pl.BlockSpec(memory_space=pltpu.MemorySpace.SMEM),       # conv3x3 bias (1, 1)
        ],
        out_specs=pl.BlockSpec((None, C, HW), lambda b: (b, 0, 0)),
        compiler_params=pltpu.CompilerParams(
            dimension_semantics=("parallel",),
            vmem_limit_bytes=32 * 1024 * 1024,      # safe on v5e/v6e/v7x
        ),
    )(x_flat, w1, b1, w2, b2, wc, bc)
    return out_flat.reshape(B, C, H, W)


def cbam_ref(x, w1, b1, w2, b2, wc, bc):
    """Pure-JAX reference mirroring the PyTorch forward."""
    avg = jnp.mean(x, axis=(2, 3), keepdims=True)
    mx = jnp.max(x, axis=(2, 3), keepdims=True)

    def fc(v):
        h = jnp.einsum('rc,bcij->brij', w1, v) + b1.reshape(1, -1, 1, 1)
        h = jnp.maximum(h, 0.0)
        return jnp.einsum('cr,brij->bcij', w2, h) + b2.reshape(1, -1, 1, 1)

    ch = jax.nn.sigmoid(fc(avg) + fc(mx))
    x = x * ch
    sp_in = jnp.stack([jnp.mean(x, axis=1), jnp.max(x, axis=1)], axis=1)  # (B,2,H,W)
    sp = jax.lax.conv_general_dilated(
        sp_in, wc.reshape(1, 2, 3, 3), (1, 1), 'SAME',
        dimension_numbers=('NCHW', 'OIHW', 'NCHW')) + bc.reshape(1, 1, 1, 1)
    sp = jax.nn.sigmoid(sp)
    return x * sp


if __name__ == "__main__":
    B, C, H, W = 2, 8, 16, 16
    reduction = 2
    Cr = C // reduction

    key = jax.random.PRNGKey(0)
    ks = jax.random.split(key, 7)
    x = jax.random.normal(ks[0], (B, C, H, W), jnp.float32)
    w1 = jax.random.normal(ks[1], (Cr, C), jnp.float32) * 0.3
    b1 = jax.random.normal(ks[2], (Cr, 1), jnp.float32) * 0.1
    w2 = jax.random.normal(ks[3], (C, Cr), jnp.float32) * 0.3
    b2 = jax.random.normal(ks[4], (C, 1), jnp.float32) * 0.1
    wc = jax.random.normal(ks[5], (2, 9), jnp.float32) * 0.3   # conv3x3 (out=1,in=2,3,3) flattened
    bc = jax.random.normal(ks[6], (1, 1), jnp.float32) * 0.1

    out = jax.block_until_ready(cbam_pallas(x, w1, b1, w2, b2, wc, bc))

    ref = cbam_ref(x, w1, b1, w2, b2, wc, bc)
    assert out.shape == ref.shape
    err = float(jnp.max(jnp.abs(out - ref)))
    assert jnp.allclose(out, ref, atol=1e-3, rtol=1e-3), f"max abs err {err}"
    print("KERNEL_OK")
</pallas_src>

<mosaic_0001>
module attributes {stable_mosaic.version = 11 : i64} {
  func.func @cbam_kernel(%arg0: i32, %arg1: memref<1x8x256xf32, #tpu.memory_space<vmem>>, %arg2: memref<4x8xf32, #tpu.memory_space<vmem>>, %arg3: memref<4x1xf32, #tpu.memory_space<vmem>>, %arg4: memref<8x4xf32, #tpu.memory_space<vmem>>, %arg5: memref<8x1xf32, #tpu.memory_space<vmem>>, %arg6: memref<2x9xf32, #tpu.memory_space<smem>>, %arg7: memref<1x1xf32, #tpu.memory_space<smem>>, %arg8: memref<1x8x256xf32, #tpu.memory_space<vmem>>) attributes {dimension_semantics = [#tpu.dimension_semantics<parallel>], iteration_bounds = array<i64: 2>, scalar_prefetch = 0 : i64, scratch_operands = 0 : i64, tpu.core_type = #tpu.core_type<tc>, window_params = [{transform_indices = @transform_0, window_bounds = array<i64: 1, 8, 256>}, {pipeline_mode = #tpu.pipeline_mode<synchronous>, transform_indices = @transform_1, window_bounds = array<i64: 4, 8>}, {pipeline_mode = #tpu.pipeline_mode<synchronous>, transform_indices = @transform_2, window_bounds = array<i64: 4, 1>}, {pipeline_mode = #tpu.pipeline_mode<synchronous>, transform_indices = @transform_3, window_bounds = array<i64: 8, 4>}, {pipeline_mode = #tpu.pipeline_mode<synchronous>, transform_indices = @transform_4, window_bounds = array<i64: 8, 1>}, {transform_indices = @transform_5, window_bounds = array<i64: 2, 9>}, {transform_indices = @transform_6, window_bounds = array<i64: 1, 1>}, {transform_indices = @transform_7, window_bounds = array<i64: 1, 8, 256>}]} {
    %c0 = arith.constant 0 : index
    %c0_0 = arith.constant 0 : index
    %c0_1 = arith.constant 0 : index
    %0 = vector.load %arg1[%c0, %c0_0, %c0_1] : memref<1x8x256xf32, #tpu.memory_space<vmem>>, vector<1x8x256xf32>
    %1 = vector.shape_cast %0 : vector<1x8x256xf32> to vector<8x256xf32>
    %cst = arith.constant dense<0.000000e+00> : vector<8xf32>
    %2 = vector.multi_reduction <add>, %1, %cst [1] : vector<8x256xf32> to vector<8xf32>
    %3 = vector.shape_cast %2 : vector<8xf32> to vector<8x1xf32>
    %cst_2 = arith.constant 3.906250e-03 : f32
    %4 = vector.broadcast %cst_2 : f32 to vector<8x1xf32>
    %5 = arith.mulf %3, %4 : vector<8x1xf32>
    %cst_3 = arith.constant dense<0xFF800000> : vector<8xf32>
    %6 = vector.multi_reduction <maximumf>, %1, %cst_3 [1] : vector<8x256xf32> to vector<8xf32>
    %7 = vector.shape_cast %6 : vector<8xf32> to vector<8x1xf32>
    %8 = tpu.concatenate %5, %7 in 1 : vector<8x1xf32>, vector<8x1xf32> -> vector<8x2xf32>
    %c0_4 = arith.constant 0 : index
    %c0_5 = arith.constant 0 : index
    %9 = vector.load %arg2[%c0_4, %c0_5] : memref<4x8xf32, #tpu.memory_space<vmem>>, vector<4x8xf32>
    %c0_6 = arith.constant 0 : index
    %c0_7 = arith.constant 0 : index
    %10 = vector.load %arg3[%c0_6, %c0_7] : memref<4x1xf32, #tpu.memory_space<vmem>>, vector<4x1xf32>
    %c0_8 = arith.constant 0 : index
    %c0_9 = arith.constant 0 : index
    %11 = vector.load %arg4[%c0_8, %c0_9] : memref<8x4xf32, #tpu.memory_space<vmem>>, vector<8x4xf32>
    %c0_10 = arith.constant 0 : index
    %c0_11 = arith.constant 0 : index
    %12 = vector.load %arg5[%c0_10, %c0_11] : memref<8x1xf32, #tpu.memory_space<vmem>>, vector<8x1xf32>
    %cst_12 = arith.constant dense<0.000000e+00> : vector<4x2xf32>
    %13 = tpu.matmul %9, %8, %cst_12 {dimension_numbers = #tpu.dot_dimension_numbers<[1], [0], [0], [1], [0, 0, 1, 1], [], []>} : vector<4x8xf32>, vector<8x2xf32>, vector<4x2xf32> -> vector<4x2xf32>
    %14 = vector.broadcast %10 : vector<4x1xf32> to vector<4x2xf32>
    %15 = arith.addf %13, %14 : vector<4x2xf32>
    %cst_13 = arith.constant 0.000000e+00 : f32
    %16 = vector.broadcast %cst_13 : f32 to vector<4x2xf32>
    %17 = arith.maximumf %15, %16 : vector<4x2xf32>
    %cst_14 = arith.constant dense<0.000000e+00> : vector<8x2xf32>
    %18 = tpu.matmul %11, %17, %cst_14 {dimension_numbers = #tpu.dot_dimension_numbers<[1], [0], [0], [1], [0, 0, 1, 1], [], []>} : vector<8x4xf32>, vector<4x2xf32>, vector<8x2xf32> -> vector<8x2xf32>
    %19 = vector.broadcast %12 : vector<8x1xf32> to vector<8x2xf32>
    %20 = arith.addf %18, %19 : vector<8x2xf32>
    %cst_15 = arith.constant dense<0.000000e+00> : vector<8xf32>
    %21 = vector.multi_reduction <add>, %20, %cst_15 [1] : vector<8x2xf32> to vector<8xf32>
    %22 = vector.shape_cast %21 : vector<8xf32> to vector<8x1xf32>
    %23 = arith.negf %22 : vector<8x1xf32>
    %24 = math.exp %23 : vector<8x1xf32>
    %cst_16 = arith.constant 1.000000e+00 : f32
    %25 = vector.broadcast %cst_16 : f32 to vector<8x1xf32>
    %26 = arith.addf %25, %24 : vector<8x1xf32>
    %27 = arith.divf %25, %26 : vector<8x1xf32>
    %28 = vector.broadcast %27 : vector<8x1xf32> to vector<8x256xf32>
    %29 = arith.mulf %1, %28 : vector<8x256xf32>
    %cst_17 = arith.constant dense<0.000000e+00> : vector<256xf32>
    %30 = vector.multi_reduction <add>, %29, %cst_17 [0] : vector<8x256xf32> to vector<256xf32>
    %31 = vector.shape_cast %30 : vector<256xf32> to vector<1x256xf32>
    %cst_18 = arith.constant 1.250000e-01 : f32
    %32 = vector.broadcast %cst_18 : f32 to vector<1x256xf32>
    %33 = arith.mulf %31, %32 : vector<1x256xf32>
    %cst_19 = arith.constant dense<0xFF800000> : vector<256xf32>
    %34 = vector.multi_reduction <maximumf>, %29, %cst_19 [0] : vector<8x256xf32> to vector<256xf32>
    %35 = vector.shape_cast %34 : vector<256xf32> to vector<1x256xf32>
    %36 = tpu.iota {dimensions = array<i32: 1>} : vector<1x256xi32>
    %c16_i32 = arith.constant 16 : i32
    %c0_i32 = arith.constant 0 : i32
    %37 = arith.cmpi eq, %c16_i32, %c0_i32 : i32
    %c1_i32 = arith.constant 1 : i32
    %38 = arith.select %37, %c1_i32, %c16_i32 : i32
    %39 = vector.broadcast %38 : i32 to vector<1x256xi32>
    %40 = arith.remsi %36, %39 : vector<1x256xi32>
    %c0_i32_20 = arith.constant 0 : i32
    %41 = vector.broadcast %c0_i32_20 : i32 to vector<1x256xi32>
    %42 = arith.cmpi ne, %40, %41 : vector<1x256xi32>
    %c0_i32_21 = arith.constant 0 : i32
    %43 = vector.broadcast %c0_i32_21 : i32 to vector<1x256xi32>
    %44 = arith.cmpi slt, %40, %43 : vector<1x256xi32>
    %c0_i32_22 = arith.constant 0 : i32
    %45 = arith.cmpi slt, %38, %c0_i32_22 : i32
    %46 = vector.broadcast %45 : i1 to vector<1x256xi1>
    %47 = vector.broadcast %46 : vector<1x256xi1> to vector<1x256xi1>
    %48 = arith.xori %44, %47 : vector<1x256xi1>
    %49 = arith.andi %48, %42 : vector<1x256xi1>
    %50 = vector.broadcast %38 : i32 to vector<1x256xi32>
    %51 = arith.addi %40, %50 : vector<1x256xi32>
    %52 = arith.select %49, %51, %40 : vector<1x256xi1>, vector<1x256xi32>
    %c0_i32_23 = arith.constant 0 : i32
    %53 = vector.broadcast %c0_i32_23 : i32 to vector<1x256xi32>
    %54 = arith.cmpi sgt, %52, %53 : vector<1x256xi32>
    %c15_i32 = arith.constant 15 : i32
    %55 = vector.broadcast %c15_i32 : i32 to vector<1x256xi32>
    %56 = arith.cmpi slt, %52, %55 : vector<1x256xi32>
    %c16_i32_24 = arith.constant 16 : i32
    %57 = vector.broadcast %c16_i32_24 : i32 to vector<1x256xi32>
    %58 = arith.cmpi sge, %36, %57 : vector<1x256xi32>
    %c240_i32 = arith.constant 240 : i32
    %59 = vector.broadcast %c240_i32 : i32 to vector<1x256xi32>
    %60 = arith.cmpi slt, %36, %59 : vector<1x256xi32>
    %cst_25 = arith.constant 0.000000e+00 : f32
    %61 = vector.broadcast %cst_25 : f32 to vector<1x256xf32>
    %c0_26 = arith.constant 0 : index
    %c0_27 = arith.constant 0 : index
    %62 = memref.load %arg7[%c0_26, %c0_27] : memref<1x1xf32, #tpu.memory_space<smem>>
    %63 = vector.broadcast %62 : f32 to vector<1x256xf32>
    %64 = arith.addf %61, %63 : vector<1x256xf32>
    %c0_28 = arith.constant 0 : index
    %c0_29 = arith.constant 0 : index
    %65 = memref.load %arg6[%c0_28, %c0_29] : memref<2x9xf32, #tpu.memory_space<smem>>
    %c1 = arith.constant 1 : index
    %c0_30 = arith.constant 0 : index
    %66 = memref.load %arg6[%c1, %c0_30] : memref<2x9xf32, #tpu.memory_space<smem>>
    %c17_i32 = arith.constant 17 : i32
    %67 = tpu.dynamic_rotate %33 by %c17_i32 dim 1 : vector<1x256xf32>, i32 -> vector<1x256xf32>
    %c17_i32_31 = arith.constant 17 : i32
    %68 = tpu.dynamic_rotate %35 by %c17_i32_31 dim 1 : vector<1x256xf32>, i32 -> vector<1x256xf32>
    %69 = vector.broadcast %65 : f32 to vector<1x256xf32>
    %70 = arith.mulf %69, %67 : vector<1x256xf32>
    %71 = vector.broadcast %66 : f32 to vector<1x256xf32>
    %72 = arith.mulf %71, %68 : vector<1x256xf32>
    %73 = arith.addf %70, %72 : vector<1x256xf32>
    %74 = arith.andi %54, %58 : vector<1x256xi1>
    %cst_32 = arith.constant 0.000000e+00 : f32
    %75 = vector.broadcast %cst_32 : f32 to vector<1x256xf32>
    %76 = arith.select %74, %73, %75 : vector<1x256xi1>, vector<1x256xf32>
    %77 = arith.addf %64, %76 : vector<1x256xf32>
    %c0_33 = arith.constant 0 : index
    %c1_34 = arith.constant 1 : index
    %78 = memref.load %arg6[%c0_33, %c1_34] : memref<2x9xf32, #tpu.memory_space<smem>>
    %c1_35 = arith.constant 1 : index
    %c1_36 = arith.constant 1 : index
    %79 = memref.load %arg6[%c1_35, %c1_36] : memref<2x9xf32, #tpu.memory_space<smem>>
    %c16_i32_37 = arith.constant 16 : i32
    %80 = tpu.dynamic_rotate %33 by %c16_i32_37 dim 1 : vector<1x256xf32>, i32 -> vector<1x256xf32>
    %c16_i32_38 = arith.constant 16 : i32
    %81 = tpu.dynamic_rotate %35 by %c16_i32_38 dim 1 : vector<1x256xf32>, i32 -> vector<1x256xf32>
    %82 = vector.broadcast %78 : f32 to vector<1x256xf32>
    %83 = arith.mulf %82, %80 : vector<1x256xf32>
    %84 = vector.broadcast %79 : f32 to vector<1x256xf32>
    %85 = arith.mulf %84, %81 : vector<1x256xf32>
    %86 = arith.addf %83, %85 : vector<1x256xf32>
    %cst_39 = arith.constant 0.000000e+00 : f32
    %87 = vector.broadcast %cst_39 : f32 to vector<1x256xf32>
    %88 = arith.select %58, %86, %87 : vector<1x256xi1>, vector<1x256xf32>
    %89 = arith.addf %77, %88 : vector<1x256xf32>
    %c0_40 = arith.constant 0 : index
    %c2 = arith.constant 2 : index
    %90 = memref.load %arg6[%c0_40, %c2] : memref<2x9xf32, #tpu.memory_space<smem>>
    %c1_41 = arith.constant 1 : index
    %c2_42 = arith.constant 2 : index
    %91 = memref.load %arg6[%c1_41, %c2_42] : memref<2x9xf32, #tpu.memory_space<smem>>
    %c15_i32_43 = arith.constant 15 : i32
    %92 = tpu.dynamic_rotate %33 by %c15_i32_43 dim 1 : vector<1x256xf32>, i32 -> vector<1x256xf32>
    %c15_i32_44 = arith.constant 15 : i32
    %93 = tpu.dynamic_rotate %35 by %c15_i32_44 dim 1 : vector<1x256xf32>, i32 -> vector<1x256xf32>
    %94 = vector.broadcast %90 : f32 to vector<1x256xf32>
    %95 = arith.mulf %94, %92 : vector<1x256xf32>
    %96 = vector.broadcast %91 : f32 to vector<1x256xf32>
    %97 = arith.mulf %96, %93 : vector<1x256xf32>
    %98 = arith.addf %95, %97 : vector<1x256xf32>
    %99 = arith.andi %56, %58 : vector<1x256xi1>
    %cst_45 = arith.constant 0.000000e+00 : f32
    %100 = vector.broadcast %cst_45 : f32 to vector<1x256xf32>
    %101 = arith.select %99, %98, %100 : vector<1x256xi1>, vector<1x256xf32>
    %102 = arith.addf %89, %101 : vector<1x256xf32>
    %c0_46 = arith.constant 0 : index
    %c3 = arith.constant 3 : index
    %103 = memref.load %arg6[%c0_46, %c3] : memref<2x9xf32, #tpu.memory_space<smem>>
    %c1_47 = arith.constant 1 : index
    %c3_48 = arith.constant 3 : index
    %104 = memref.load %arg6[%c1_47, %c3_48] : memref<2x9xf32, #tpu.memory_space<smem>>
    %c1_i32_49 = arith.constant 1 : i32
    %105 = tpu.dynamic_rotate %33 by %c1_i32_49 dim 1 : vector<1x256xf32>, i32 -> vector<1x256xf32>
    %c1_i32_50 = arith.constant 1 : i32
    %106 = tpu.dynamic_rotate %35 by %c1_i32_50 dim 1 : vector<1x256xf32>, i32 -> vector<1x256xf32>
    %107 = vector.broadcast %103 : f32 to vector<1x256xf32>
    %108 = arith.mulf %107, %105 : vector<1x256xf32>
    %109 = vector.broadcast %104 : f32 to vector<1x256xf32>
    %110 = arith.mulf %109, %106 : vector<1x256xf32>
    %111 = arith.addf %108, %110 : vector<1x256xf32>
    %cst_51 = arith.constant 0.000000e+00 : f32
    %112 = vector.broadcast %cst_51 : f32 to vector<1x256xf32>
    %113 = arith.select %54, %111, %112 : vector<1x256xi1>, vector<1x256xf32>
    %114 = arith.addf %102, %113 : vector<1x256xf32>
    %c0_52 = arith.constant 0 : index
    %c4 = arith.constant 4 : index
    %115 = memref.load %arg6[%c0_52, %c4] : memref<2x9xf32, #tpu.memory_space<smem>>
    %c1_53 = arith.constant 1 : index
    %c4_54 = arith.constant 4 : index
    %116 = memref.load %arg6[%c1_53, %c4_54] : memref<2x9xf32, #tpu.memory_space<smem>>
    %117 = vector.broadcast %115 : f32 to vector<1x256xf32>
    %118 = arith.mulf %117, %33 : vector<1x256xf32>
    %119 = vector.broadcast %116 : f32 to vector<1x256xf32>
    %120 = arith.mulf %119, %35 : vector<1x256xf32>
    %121 = arith.addf %118, %120 : vector<1x256xf32>
    %122 = arith.addf %114, %121 : vector<1x256xf32>
    %c0_55 = arith.constant 0 : index
    %c5 = arith.constant 5 : index
    %123 = memref.load %arg6[%c0_55, %c5] : memref<2x9xf32, #tpu.memory_space<smem>>
    %c1_56 = arith.constant 1 : index
    %c5_57 = arith.constant 5 : index
    %124 = memref.load %arg6[%c1_56, %c5_57] : memref<2x9xf32, #tpu.memory_space<smem>>
    %c255_i32 = arith.constant 255 : i32
    %125 = tpu.dynamic_rotate %33 by %c255_i32 dim 1 : vector<1x256xf32>, i32 -> vector<1x256xf32>
    %c255_i32_58 = arith.constant 255 : i32
    %126 = tpu.dynamic_rotate %35 by %c255_i32_58 dim 1 : vector<1x256xf32>, i32 -> vector<1x256xf32>
    %127 = vector.broadcast %123 : f32 to vector<1x256xf32>
    %128 = arith.mulf %127, %125 : vector<1x256xf32>
    %129 = vector.broadcast %124 : f32 to vector<1x256xf32>
    %130 = arith.mulf %129, %126 : vector<1x256xf32>
    %131 = arith.addf %128, %130 : vector<1x256xf32>
    %cst_59 = arith.constant 0.000000e+00 : f32
    %132 = vector.broadcast %cst_59 : f32 to vector<1x256xf32>
    %133 = arith.select %56, %131, %132 : vector<1x256xi1>, vector<1x256xf32>
    %134 = arith.addf %122, %133 : vector<1x256xf32>
    %c0_60 = arith.constant 0 : index
    %c6 = arith.constant 6 : index
    %135 = memref.load %arg6[%c0_60, %c6] : memref<2x9xf32, #tpu.memory_space<smem>>
    %c1_61 = arith.constant 1 : index
    %c6_62 = arith.constant 6 : index
    %136 = memref.load %arg6[%c1_61, %c6_62] : memref<2x9xf32, #tpu.memory_space<smem>>
    %c241_i32 = arith.constant 241 : i32
    %137 = tpu.dynamic_rotate %33 by %c241_i32 dim 1 : vector<1x256xf32>, i32 -> vector<1x256xf32>
    %c241_i32_63 = arith.constant 241 : i32
    %138 = tpu.dynamic_rotate %35 by %c241_i32_63 dim 1 : vector<1x256xf32>, i32 -> vector<1x256xf32>
    %139 = vector.broadcast %135 : f32 to vector<1x256xf32>
    %140 = arith.mulf %139, %137 : vector<1x256xf32>
    %141 = vector.broadcast %136 : f32 to vector<1x256xf32>
    %142 = arith.mulf %141, %138 : vector<1x256xf32>
    %143 = arith.addf %140, %142 : vector<1x256xf32>
    %144 = arith.andi %54, %60 : vector<1x256xi1>
    %cst_64 = arith.constant 0.000000e+00 : f32
    %145 = vector.broadcast %cst_64 : f32 to vector<1x256xf32>
    %146 = arith.select %144, %143, %145 : vector<1x256xi1>, vector<1x256xf32>
    %147 = arith.addf %134, %146 : vector<1x256xf32>
    %c0_65 = arith.constant 0 : index
    %c7 = arith.constant 7 : index
    %148 = memref.load %arg6[%c0_65, %c7] : memref<2x9xf32, #tpu.memory_space<smem>>
    %c1_66 = arith.constant 1 : index
    %c7_67 = arith.constant 7 : index
    %149 = memref.load %arg6[%c1_66, %c7_67] : memref<2x9xf32, #tpu.memory_space<smem>>
    %c240_i32_68 = arith.constant 240 : i32
    %150 = tpu.dynamic_rotate %33 by %c240_i32_68 dim 1 : vector<1x256xf32>, i32 -> vector<1x256xf32>
    %c240_i32_69 = arith.constant 240 : i32
    %151 = tpu.dynamic_rotate %35 by %c240_i32_69 dim 1 : vector<1x256xf32>, i32 -> vector<1x256xf32>
    %152 = vector.broadcast %148 : f32 to vector<1x256xf32>
    %153 = arith.mulf %152, %150 : vector<1x256xf32>
    %154 = vector.broadcast %149 : f32 to vector<1x256xf32>
    %155 = arith.mulf %154, %151 : vector<1x256xf32>
    %156 = arith.addf %153, %155 : vector<1x256xf32>
    %cst_70 = arith.constant 0.000000e+00 : f32
    %157 = vector.broadcast %cst_70 : f32 to vector<1x256xf32>
    %158 = arith.select %60, %156, %157 : vector<1x256xi1>, vector<1x256xf32>
    %159 = arith.addf %147, %158 : vector<1x256xf32>
    %c0_71 = arith.constant 0 : index
    %c8 = arith.constant 8 : index
    %160 = memref.load %arg6[%c0_71, %c8] : memref<2x9xf32, #tpu.memory_space<smem>>
    %c1_72 = arith.constant 1 : index
    %c8_73 = arith.constant 8 : index
    %161 = memref.load %arg6[%c1_72, %c8_73] : memref<2x9xf32, #tpu.memory_space<smem>>
    %c239_i32 = arith.constant 239 : i32
    %162 = tpu.dynamic_rotate %33 by %c239_i32 dim 1 : vector<1x256xf32>, i32 -> vector<1x256xf32>
    %c239_i32_74 = arith.constant 239 : i32
    %163 = tpu.dynamic_rotate %35 by %c239_i32_74 dim 1 : vector<1x256xf32>, i32 -> vector<1x256xf32>
    %164 = vector.broadcast %160 : f32 to vector<1x256xf32>
    %165 = arith.mulf %164, %162 : vector<1x256xf32>
    %166 = vector.broadcast %161 : f32 to vector<1x256xf32>
    %167 = arith.mulf %166, %163 : vector<1x256xf32>
    %168 = arith.addf %165, %167 : vector<1x256xf32>
    %169 = arith.andi %56, %60 : vector<1x256xi1>
    %cst_75 = arith.constant 0.000000e+00 : f32
    %170 = vector.broadcast %cst_75 : f32 to vector<1x256xf32>
    %171 = arith.select %169, %168, %170 : vector<1x256xi1>, vector<1x256xf32>
    %172 = arith.addf %159, %171 : vector<1x256xf32>
    %173 = arith.negf %172 : vector<1x256xf32>
    %174 = math.exp %173 : vector<1x256xf32>
    %cst_76 = arith.constant 1.000000e+00 : f32
    %175 = vector.broadcast %cst_76 : f32 to vector<1x256xf32>
    %176 = arith.addf %175, %174 : vector<1x256xf32>
    %177 = arith.divf %175, %176 : vector<1x256xf32>
    %178 = vector.broadcast %177 : vector<1x256xf32> to vector<8x256xf32>
    %179 = arith.mulf %29, %178 : vector<8x256xf32>
    %c0_77 = arith.constant 0 : index
    %c0_78 = arith.constant 0 : index
    %c0_79 = arith.constant 0 : index
    %180 = vector.load %arg8[%c0_77, %c0_78, %c0_79] : memref<1x8x256xf32, #tpu.memory_space<vmem>>, vector<1x8x256xf32>
    %181 = vector.shape_cast %180 : vector<1x8x256xf32> to vector<8x256xf32>
    %182 = vector.shape_cast %179 : vector<8x256xf32> to vector<1x8x256xf32>
    tpu.vector_store %arg8[%c0_77, %c0_78, %c0_79], %182 {strides = array<i32>} : memref<1x8x256xf32, #tpu.memory_space<vmem>>, vector<1x8x256xf32>,
    return
  }
  func.func @transform_0(%arg0: i32) -> (i32, i32, i32) {
    %c0_i32 = arith.constant 0 : i32
    %c0_i32_0 = arith.constant 0 : i32
    %c0_i32_1 = arith.constant 0 : i32
    return %arg0, %c0_i32, %c0_i32_0 : i32, i32, i32
  }
  func.func @transform_1(%arg0: i32) -> (i32, i32) {
    %c0_i32 = arith.constant 0 : i32
    %c0_i32_0 = arith.constant 0 : i32
    %c0_i32_1 = arith.constant 0 : i32
    return %c0_i32, %c0_i32_0 : i32, i32
  }
  func.func @transform_2(%arg0: i32) -> (i32, i32) {
    %c0_i32 = arith.constant 0 : i32
    %c0_i32_0 = arith.constant 0 : i32
    %c0_i32_1 = arith.constant 0 : i32
    return %c0_i32, %c0_i32_0 : i32, i32
  }
  func.func @transform_3(%arg0: i32) -> (i32, i32) {
    %c0_i32 = arith.constant 0 : i32
    %c0_i32_0 = arith.constant 0 : i32
    %c0_i32_1 = arith.constant 0 : i32
    return %c0_i32, %c0_i32_0 : i32, i32
  }
  func.func @transform_4(%arg0: i32) -> (i32, i32) {
    %c0_i32 = arith.constant 0 : i32
    %c0_i32_0 = arith.constant 0 : i32
    %c0_i32_1 = arith.constant 0 : i32
    return %c0_i32, %c0_i32_0 : i32, i32
  }
  func.func @transform_5(%arg0: i32) -> (i32, i32) {
    %c0_i32 = arith.constant 0 : i32
    %c0_i32_0 = arith.constant 0 : i32
    %c0_i32_1 = arith.constant 0 : i32
    return %c0_i32, %c0_i32_0 : i32, i32
  }
  func.func @transform_6(%arg0: i32) -> (i32, i32) {
    %c0_i32 = arith.constant 0 : i32
    %c0_i32_0 = arith.constant 0 : i32
    %c0_i32_1 = arith.constant 0 : i32
    return %c0_i32, %c0_i32_0 : i32, i32
  }
  func.func @transform_7(%arg0: i32) -> (i32, i32, i32) {
    %c0_i32 = arith.constant 0 : i32
    %c0_i32_0 = arith.constant 0 : i32
    %c0_i32_1 = arith.constant 0 : i32
    return %arg0, %c0_i32, %c0_i32_0 : i32, i32, i32
  }
}

</mosaic_0001>

<bundles_post_ra>
// kernel: tpu_custom_call.1
= control target key start
LH: loop header
LB: loop body
LE: loop exit
PB: predicated region body
PF: predicated region fallthrough
CT: control target
= control target key end

     0   :  { %s1739_s0 = inlined_call_operand.hbm [shape: f32[2,8,256], index: 0, kind: input, shape index: {}]   ;;  %s1740_s1 = inlined_call_operand.vmem [shape: f32[4,8], index: 1, kind: input, shape index: {}]   ;;  %s1741_s2 = inlined_call_operand.vmem [shape: f32[4,1], index: 2, kind: input, shape index: {}]   ;;  %s1742_s3 = inlined_call_operand.vmem [shape: f32[8,4], index: 3, kind: input, shape index: {}]   ;;  %s1743_s4 = inlined_call_operand.vmem [shape: f32[8,1], index: 4, kind: input, shape index: {}]   ;;  %s1744_s5 = inlined_call_operand.vmem [shape: f32[2,9], index: 5, kind: input, shape index: {}]   ;;  %s1745_s6 = inlined_call_operand.<no memory space> [shape: f32[1,1], index: 6, kind: input, shape index: {}]   ;;  %s1746_s7 = inlined_call_operand.hbm [shape: f32[2,8,256], index: 7, kind: output, shape index: {}]  }
   0x1   :  { %1751 = sst [smem:[#allocation12_spill]] %s1744_s5 }
   0x2   :  { %12 = sst [smem:[#allocation2]] %s1745_s6 }
   0x3   :  { %13 = vsyncpa [#allocation4], 0 }
   0x4   :  { %15 = vsyncpa [#allocation4 + $0x1], 0 }
   0x5   :  { %16 = vsyncpa [#allocation6], 0 }
   0x6   :  { %17 = vsyncpa [#allocation5], 0 }
   0x7   :  { %19 = vsyncpa [#allocation5 + $0x1], 0  ;;  %s1228_s26 = smov 0   ;;  %s1230_s27 = smov 0  }
   0x8   :  { %s1232_s28 = smov 0   ;;  %s1234_s29 = smov 0  }
   0x9 LB: > { %s1249_s6 = sadd.s32 4294967295, %s1169_s29   ;;  %s921_s30 = sadd.s32 4294967294, %s1169_s29   ;;  %s1169_s29 = sphi %s1234_s29, %s1785_s29   ;;  %s1165_s28 = sphi %s1232_s28, %s1784_s28   ;;  %s1161_s27 = sphi %s1230_s27, %s1783_s27   ;;  %s1157_s26 = sphi %s1228_s26, %s1782_s26  }
   0xa   : > { %p45_p0 = scmp.ne.s32.totalorder %s1161_s27, %s1157_s26  ;;  %p1747_p1 = scmp.eq.s32.totalorder %s1249_s6, 0 }
   0xb   : > { %p201_p3 = scmp.eq.s32.totalorder %s921_s30, 1  ;;  %p922_p5 = scmp.ge.s32.totalorder %s1169_s29, 1 }
   0xc   : > { %p1258_p4 = por %p1747_p1, %p45_p0  ;;  %p208_p7 = scmp.lt.s32.totalorder %s1169_s29, 3 }
   0xd   : > { %p1263_p6 = por %p201_p3, %p45_p0  ;;  %s1754_s5 = sld [smem:[#allocation12_spill]] }
   0xe   : > { %s1752_s8 = scalar_select %p1258_p4, 1, 0 }
   0xf   : > { %s1753_s9 = scalar_select %p1263_p6, 1, 0 }
  0x10   : > { %p1271_p8 = pnand %p922_p5, %p208_p7  ;;  %s1279_s14 = sadd.s32 1, %s1169_s29  }
  0x11   : > { %s29_s16 = ssub.s32 %s1169_s29, %s1279_s14  ;;  %s32_s18 = sadd.s32 1, %s1165_s28 }
  0x12   : > { %s1755_s13 = scalar_select %p1271_p8, 1, 0 }
  0x13   : > { %s233_s12 = sshll.u32 %s1754_s5, 4  ;;  %p984_p10 = pneg %p1271_p8  ;;  %s234_s12 = int_to_ptr.vmem [resolvable:$true] %s233_s12 }
  0x14   : > { %p1289_p12 = scmp.eq.s32.totalorder %s29_s16, 0  ;;  %p39_p13 = scmp.ne.s32.totalorder %s1165_s28, %s1161_s27 }
  0x15   : > { %p1283_p11 = pnand %p984_p10, %p1747_p1  ;;  %s1058_s19 = scalar_lea.vmem %s234_s12, 32 }
  0x16   : > { %p1059_p0 = scmp.ne.s32.totalorder %s234_s12, %s1058_s19  ;;  %p1066_p9 = scmp.lt.s32.totalorder %s234_s12, %s234_s12 }
  0x17   : > { %p1060_p3 = pneg %p1283_p11  ;;  %p1067_p2 = scmp.lt.s32.totalorder %s1058_s19, %s1058_s19 }
  0x19   : > { %p1061_p5 = pnand %p1060_p3, %p1059_p0  ;;  %p1068_p10 = por %p1067_p2, %p1066_p9 }
  0x1b   : > { %p1062_p7 = pneg %p1061_p5 }
  0x1d   : > { %p1069_p1 = pnand %p1068_p10, %p1062_p7 }
  0x1f   : > { %1072 = shalt.err (!%p1069_p1)
}
  0x20   : > { %s1171_s20 = smov [#allocation7]   ;;  %p40_p2 = scmp.eq.s32.totalorder %s1169_s29, 0 }
  0x21   : > { %987 = dma.vmem_to_smem (!%p1283_p11), %s234_s12, 32, %s1171_s20, [#allocation6]  }
  0x22   : > { %s1303_s21 = scalar_select %p1289_p12, %s1165_s28, %s32_s18  }
  0x23   : > { %p1758_p1 = scmp.eq.s32.totalorder %s1249_s6, 1  ;;  %p997_p0 = scmp.lt.s32.totalorder %s1169_s29, 2 }
  0x24   : > { %s247_s23 = sand.u32 1, %s1165_s28   ;;  %p41_p3 = por %p40_p2, %p39_p13 }
  0x25   : > { %p1311_p9 = por %p1758_p1, %p39_p13  ;;  %s925_s24 = sshll.u32 %s247_s23, 4 }
  0x26   : > { %s960_s25 = sshll.u32 %s1169_s29, 8  ;;  %s251_s12 = scalar_lea.vmem [#allocation3], %s925_s24 }
  0x27   : > { %s1759_s22 = scalar_select %p1311_p9, 1, 0 }
  0x28   : > { %s1324_s11 = scalar_lea.hbm %s1739_s0, %s960_s25  ;;  %s259_s15 = sshll.u32 %s251_s12, 4  ;;  %s260_s15 = int_to_ptr.vmem [resolvable:$true] %s259_s15 }
  0x29   : > { %p1326_p11 = pnand %p997_p0, %p41_p3  ;;  %s248_s17 = scalar_lea.sflag [#allocation4], %s247_s23 }
  0x2a   : > { %s1073_s18 = scalar_lea.hbm %s1324_s11, 256  ;;  %s1078_s25 = scalar_lea.hbm %s1739_s0, 512 }
  0x2b   : > { %p1074_p12 = scmp.ne.s32.totalorder %s1324_s11, %s1073_s18  ;;  %p1075_p13 = pneg %p1326_p11 }
  0x2c   : > { %p1079_p10 = scmp.lt.s32.totalorder %s1324_s11, %s1739_s0  ;;  %p1080_p2 = scmp.lt.s32.totalorder %s1078_s25, %s1073_s18 }
  0x2d   : > { %p1076_p5 = pnand %p1075_p13, %p1074_p12 }
  0x2e   : > { %p1081_p1 = por %p1080_p2, %p1079_p10 }
  0x2f   : > { %p1077_p7 = pneg %p1076_p5 }
  0x31   : > { %p1082_p0 = pnand %p1081_p1, %p1077_p7 }
  0x33   : > { %1085 = shalt.err (!%p1082_p0)
}
  0x34   : > { %s1086_s10 = scalar_lea.vmem %s260_s15, 256  ;;  %s1172_s23 = smov [#allocation3]  }
  0x35   : > { %p1087_p3 = scmp.ne.s32.totalorder %s260_s15, %s1086_s10  ;;  %s1091_s12 = sshll.u32 %s1172_s23, 4  ;;  %s1092_s12 = int_to_ptr.vmem [resolvable:$false] %s1091_s12 }
  0x36   : > { %s1093_s5 = scalar_lea.vmem %s1092_s12, 512  ;;  %p1094_p12 = scmp.lt.s32.totalorder %s260_s15, %s1092_s12 }
  0x37   : > { %p1089_p6 = pnand %p1087_p3, %p1075_p13  ;;  %p1095_p5 = scmp.lt.s32.totalorder %s1093_s5, %s1086_s10 }
  0x39   : > { %p1090_p9 = pneg %p1089_p6  ;;  %p1096_p4 = por %p1095_p5, %p1094_p12 }
  0x3b   : > { %p1097_p8 = pnand %p1096_p4, %p1090_p9 }
  0x3d   : > { %1100 = shalt.err (!%p1097_p8)
}
  0x3e   : > { %991 = dma.hbm_to_vmem [thread:$0]  (!%p1326_p11), %s1324_s11, 256, %s260_s15, %s248_s17  }
  0x3f   : > { %p1761_p7 = scmp.ne.s32.totalorder %s1755_s13, 0 }
  0x40   : > { %s1347_s18 = sand.u32 (!%p1761_p7), 1, %s1161_s27   ;;  %p1762_p4 = scmp.ne.s32.totalorder (!%p1761_p7), %s1752_s8, 0 }
  0x41   : > { %268 = sbr.rel (%p1761_p7) target bundleno = 1047 (0x417), region = 48  ;;  %s929_s19 = sshll.u32 (!%p1761_p7), %s1347_s18, 4 }
  0x42   : > { %s271_s20 = scalar_lea.sflag (!%p1761_p7), [#allocation4], %s1347_s18  ;;  %s274_s5 = scalar_lea.vmem (!%p1761_p7), [#allocation3], %s929_s19 }
  0x46   : > { %1144 = dma.done.wait (%p1762_p4), %s271_s20, 256  }
  0x47   : > { %1146 = vsyncadd (%p1762_p4), %s271_s20, 4294967040  ;;  %p1763_p6 = scmp.eq.s32.totalorder %s1249_s6, 0 }
  0x49   : > { %1148 = dma.done.wait (%p1763_p6), [#allocation6], 32   ;;  %p1764_p8 = pmov %p1763_p6 }
  0x4b   : > { %1150 = vsyncadd (%p1764_p8), [#allocation6], 4294967264 }
  0x4c   : > { %283 = sfence }
  0x4d   : > { %v310_v0 = vld [vmem:[%s274_s5] sm:$0xff]  ;;  %v311_v1 = vld [vmem:[%s274_s5 + $0x8] sm:$0xff]  ;;  %v1173_v4 = vmov 0.0   ;;  %vm1174_vm0 = vmmov 0   ;;  %v1175_v6 = vmov 0   ;;  %vm319_vm1 = vcmask 7168  }
  0x4e   : > { %v312_v2 = vadd.f32 %v311_v1, %v310_v0  ;;  %v316_v3 = vmax.f32 %v310_v0, %v311_v1  ;;  %966 = vmatprep.subr.mxu0 %v1173_v4  ;;  %971 = vmatprep.subr.mxu1 %v1173_v4  ;;  %v322_v5 = vld [vmem:[%s1741_s2] sm:$0xf]  ;;  %vm330_vm2 = vcmask 64512   ;;  %vm414_vm3 = vcmask 1043456   ;;  %s1382_s24 = sld [smem:[#allocation7 + $0x84]]  ;;  %s1176_s23 = smov 15  }
  0x4f   : > { %968 = vmatprep.mubr.msk.f32.mxu0 %vm1174_vm0, %v1173_v4  ;;  %973 = vmatprep.mubr.msk.f32.mxu1 %vm1174_vm0, %v1173_v4  ;;  %v324_v7 = vld [vmem:[%s1743_s4] sm:$0xff]  ;;  %vm410_vm4 = vcmask 31744   ;;  %vm488_vm5 = vcmask 15360   ;;  %s1384_s10 = sld [smem:[#allocation7 + $0x4]]  ;;  %s1177_s12 = smov 17  }
  0x50   : > { %313 = vadd.xlane.f32.xlu0 %v312_v2  ;;  %1044 = vset.pattern.permute.xlu1 %v1175_v6  ;;  %v321_v11 = vld [vmem:[%s1740_s1] sm:$0xf]  ;;  %s1178_s20 = smov 1   ;;  %s1179_s5 = smov 127  }
  0x51   : > { %1045 = vset.pattern.permute.xlu0 %v1175_v6  ;;  %327 = vperm.xlu1 %1044, %v322_v5   ;;  %v323_v18 = vld [vmem:[%s1742_s3] sm:$0xff]  ;;  %s1180_s8 = smov 16   ;;  %s1181_s13 = smov 113  }
  0x52   : > { %s1182_s11 = smov 112   ;;  %s1183_s15 = smov 111  }
  0x53   : > { %s1443_s16 = sld [smem:[#allocation7 + $0x80]]  ;;  %p1779_p11 = scmp.ne.s32.totalorder %s1759_s22, 0 }
  0x54   : > { %317 = vmax.xlane.f32.xlu0 %v316_v3  ;;  %v681_v49 = vstv %s1382_s24  ;;  %s1445_s17 = sld [smem:[#allocation7 + $0x81]] }
  0x55   : > { %407 = vperm.xlu1 %1044, %v324_v7   ;;  %v678_v48 = vstv %s1384_s10  ;;  %s1447_s25 = sld [smem:[#allocation7 + $0x82]] }
  0x56   : > { %s1449_s30 = sld [smem:[#allocation7 + $0x83]] }
  0x57   : > { %s1489_s24 = sld [smem:[#allocation7 + $0x3]] }
  0x58   : > { %s1534_s10 = sld [smem:[#allocation7 + $0x5]] }
  0xcc   : > { %v328_v13 = vpop.permute.xlu1 %327 }
  0xd0   : > { %v408_v19 = vpop.permute.xlu1 %407 }
  0xd9   : > { %v314_v8 = vpop.xlane.xlu0 %313 }
  0xda   : > { %v315_v9 = vmul.f32 0.00390625, %v314_v8 }
  0xdd   : > { %v318_v10 = vpop.xlane.xlu0 %317 }
  0xde   : > { %v320_v12 = vsel %vm319_vm1, %v315_v9, %v318_v10  ;;  %v526_v10 = vlaneseq }
  0xdf   : > { %967 = vmatpush3.msra.mxu0 %v320_v12 }
  0xe0   : > { %969 = vmatmul.mubr.msk.f32.vlgmr.msra.gmra.mxu0 %vm330_vm2, %v321_v11  ;;  %v1460_v12 = vand.u32 127, %v526_v10 }
  0xe2   : > { %vm570_vm6 = vcmp.lt.s32.totalorder %v1460_v12, 17  ;;  %vm599_vm7 = vcmp.lt.s32.totalorder %v1460_v12, 16  ;;  %vm626_vm8 = vcmp.lt.s32.totalorder %v1460_v12, 15  ;;  %vm655_vm9 = vcmp.lt.s32.totalorder %v1460_v12, 1 }
  0xe3   : > { %vm557_vm10 = vcmp.ge.s32.totalorder %v1460_v12, 16  ;;  %vm694_vm11 = vcmp.lt.s32.totalorder %v1460_v12, 127  ;;  %vm721_vm15 = vcmp.lt.s32.totalorder %v1460_v12, 113  ;;  %vm750_vm2 = vcmp.lt.s32.totalorder %v1460_v12, 112 }
 0x1a0   : > { %v400_v14 = vpop.f32.mrf.mxu0 }
 0x1a1   : > { %v401_v15 = vadd.f32 %v400_v14, %v328_v13 }
 0x1a2   : > { %v970_v16 = vpop.f32.mrf.mxu0 }
 0x1a3   : > { %v404_v17 = vmax.f32 %v401_v15, 0.0  ;;  %v1469_v16 = vadd.s32 128, %v1460_v12 }
 0x1a5   : > { %972 = vmatpush3.msk.msra.mxu1 %vm414_vm3, %v404_v17 }
 0x1a6   : > { %974 = vmatmul.mubr.msk.f32.vlgmr.msra.gmra.mxu1 %vm410_vm4, %v323_v18  ;;  %v582_v18 = vstv %s1443_s16  ;;  %s1593_s16 = sld [smem:[#allocation7 + $0x87]]  ;;  %vm560_vm4 = vcmp.lt.s32.totalorder %v1469_v16, 240 }
 0x266   : > { %v484_v20 = vpop.f32.mrf.mxu1 }
 0x267   : > { %v485_v21 = vadd.f32 %v484_v20, %v408_v19  ;;  %v611_v20 = vstv %s1445_s17  ;;  %s1628_s17 = sld [smem:[#allocation7 + $0x8]] }
 0x268   : > { %v975_v22 = vpop.f32.mrf.mxu1 }
 0x269   : > { %v489_v23 = vsel %vm488_vm5, %v485_v21, 0.0  ;;  %v638_v21 = vstv %s1447_s25  ;;  %s1638_s25 = sld [smem:[#allocation7 + $0x88]]  ;;  %vm777_vm5 = vcmp.lt.s32.totalorder %v1460_v12, 111 }
 0x26a   : > { %490 = vadd.xlane.f32.xlu0 %v489_v23 }
 0x2f3   : > { %v491_v24 = vpop.xlane.xlu0 %490 }
 0x2f4   : > { %v935_v25 = vmul.f32 -1.442695, %v491_v24  ;;  %v533_v24 = vand.u32 15, %v1460_v12 }
 0x2f6   : > { %1046 = vpow2.f32 %v935_v25  ;;  %v540_v25 = vand.u32 15, %v1469_v16  ;;  %vm1510_vm12 = vcmp.gt.s32.totalorder %v533_v24, 0  ;;  %vm1530_vm14 = vcmp.lt.s32.totalorder %v533_v24, 15 }
 0x2f7   : > { %vm1551_vm0 = vmand %vm1510_vm12, %vm557_vm10 }
 0x2f8   : > { %vm1514_vm13 = vcmp.gt.s32.totalorder %v540_v25, 0  ;;  %vm1566_vm1 = vcmp.lt.s32.totalorder %v540_v25, 15  ;;  %vm1583_vm3 = vmand %vm1530_vm14, %vm557_vm10 }
 0x303   : > { %v1047_v26 = vpop.eup %1046 }
 0x304   : > { %v495_v27 = vadd.f32 1.0, %v1047_v26 }
 0x306   : > { %1048 = vrcp.f32 %v495_v27 }
 0x313   : > { %v1049_v28 = vpop.eup %1048 }
 0x314   : > { %v1373_v29 = vmul.f32 %v1049_v28, %v310_v0  ;;  %v1375_v30 = vmul.f32 %v1049_v28, %v311_v1  ;;  %v667_v28 = vstv %s1449_s30  ;;  %s961_s30 = sshll.u32 %s1249_s6, 8  ;;  %s1184_s6 = smov [#allocation8]  }
 0x316   : > { %v500_v31 = vrot.slane %v1373_v29, 4  ;;  %v506_v32 = vrot.slane %v1375_v30, 4 }
 0x318   : > { %v501_v33 = vadd.f32 %v500_v31, %v1373_v29  ;;  %v515_v34 = vmax.f32 %v1373_v29, %v500_v31  ;;  %v521_v35 = vmax.f32 %v1375_v30, %v506_v32  ;;  %v507_v45 = vadd.f32 %v506_v32, %v1375_v30 }
 0x31a   : > { %v502_v36 = vrot.slane %v501_v33, 2  ;;  %v516_v37 = vrot.slane %v515_v34, 2  ;;  %v522_v38 = vrot.slane %v521_v35, 2  ;;  %v508_v51 = vrot.slane %v507_v45, 2 }
 0x31c   : > { %v503_v39 = vadd.f32 %v502_v36, %v501_v33  ;;  %v517_v40 = vmax.f32 %v515_v34, %v516_v37  ;;  %v523_v41 = vmax.f32 %v521_v35, %v522_v38  ;;  %v509_v56 = vadd.f32 %v508_v51, %v507_v45 }
 0x31e   : > { %v504_v42 = vrot.slane %v503_v39, 1  ;;  %v518_v43 = vrot.slane %v517_v40, 1  ;;  %v524_v47 = vrot.slane %v523_v41, 1  ;;  %v510_v57 = vrot.slane %v509_v56, 1 }
 0x320   : > { %v505_v44 = vadd.f32 %v504_v42, %v503_v39  ;;  %v519_v46 = vmax.f32 %v517_v40, %v518_v43  ;;  %v1391_v52 = vmax.f32 %v523_v41, %v524_v47  ;;  %v511_v58 = vadd.f32 %v510_v57, %v509_v56 }
 0x322   : > { %v512_v50 = vmul.f32 0.125, %v505_v44  ;;  %629 = vrot.lane.b32.xlu0 %v519_v46, %s1176_s23  ;;  %573 = vrot.lane.b32.xlu1 %v519_v46, %s1177_s12  ;;  %v682_v53 = vmul.f32 %v681_v49, %v519_v46  ;;  %v513_v59 = vmul.f32 0.125, %v511_v58  ;;  %v683_v17 = vmul.f32 %v681_v49, %v1391_v52 }
 0x324   : > { %v679_v54 = vmul.f32 %v678_v48, %v512_v50  ;;  %v680_v15 = vmul.f32 %v678_v48, %v513_v59 }
 0x326   : > { %658 = vrot.lane.b32.xlu0 %v519_v46, %s1178_s20  ;;  %575 = vrot.lane.b32.xlu1 %v1391_v52, %s1177_s12  ;;  %v1400_v55 = vadd.f32 %v682_v53, %v679_v54  ;;  %v1482_v22 = vadd.f32 %v683_v17, %v680_v15 }
 0x32a   : > { %697 = vrot.lane.b32.xlu0 %v519_v46, %s1179_s5  ;;  %602 = vrot.lane.b32.xlu1 %v519_v46, %s1180_s8 }
 0x32e   : > { %724 = vrot.lane.b32.xlu0 %v519_v46, %s1181_s13  ;;  %604 = vrot.lane.b32.xlu1 %v1391_v52, %s1180_s8 }
 0x332   : > { %753 = vrot.lane.b32.xlu0 %v519_v46, %s1182_s11  ;;  %631 = vrot.lane.b32.xlu1 %v1391_v52, %s1176_s23 }
 0x336   : > { %568 = vrot.lane.b32.xlu0 %v513_v59, %s1177_s12  ;;  %660 = vrot.lane.b32.xlu1 %v1391_v52, %s1178_s20 }
 0x33a   : > { %699 = vrot.lane.b32.xlu1 %v1391_v52, %s1179_s5  ;;  %622 = vrot.lane.b32.xlu0 %v512_v50, %s1176_s23 }
 0x33e   : > { %726 = vrot.lane.b32.xlu1 %v1391_v52, %s1181_s13  ;;  %651 = vrot.lane.b32.xlu0 %v512_v50, %s1178_s20 }
 0x342   : > { %755 = vrot.lane.b32.xlu1 %v1391_v52, %s1182_s11  ;;  %690 = vrot.lane.b32.xlu0 %v512_v50, %s1179_s5 }
 0x346   : > { %717 = vrot.lane.b32.xlu0 %v512_v50, %s1181_s13  ;;  %566 = vrot.lane.b32.xlu1 %v512_v50, %s1177_s12  ;;  %s1455_s12 = sld [smem:[#allocation7]] }
 0x34a   : > { %746 = vrot.lane.b32.xlu0 %v512_v50, %s1182_s11  ;;  %595 = vrot.lane.b32.xlu1 %v512_v50, %s1180_s8 }
 0x34c   : > { %v579_v26 = vstv %s1455_s12 }
 0x34e   : > { %773 = vrot.lane.b32.xlu0 %v512_v50, %s1183_s15  ;;  %597 = vrot.lane.b32.xlu1 %v513_v59, %s1180_s8  ;;  %s1464_s8 = sld [smem:[#allocation2]] }
 0x352   : > { %780 = vrot.lane.b32.xlu0 %v519_v46, %s1183_s15  ;;  %624 = vrot.lane.b32.xlu1 %v513_v59, %s1176_s23  ;;  %s1453_s23 = sld [smem:[#allocation7 + $0x85]] }
 0x354   : > { %v562_v43 = vstv %s1464_s8  ;;  %s1702_s8 = scalar_lea.hbm %s1746_s7, %s961_s30 }
 0x356   : > { %653 = vrot.lane.b32.xlu1 %v513_v59, %s1178_s20  ;;  %s1457_s20 = sld [smem:[#allocation7 + $0x86]] }
 0x358   : > { %v706_v31 = vstv %s1453_s23  ;;  %s309_s23 = scalar_lea.vmem [#allocation8], %s929_s19  ;;  %s1105_s19 = sshll.u32 %s1184_s6, 4  ;;  %s1106_s19 = int_to_ptr.vmem [resolvable:$false] %s1105_s19 }
 0x359   : > { %s839_s12 = sshll.u32 %s309_s23, 4  ;;  %s840_s12 = int_to_ptr.vmem [resolvable:$true] %s839_s12 }
 0x35a   : > { %692 = vrot.lane.b32.xlu1 %v513_v59, %s1179_s5  ;;  %s1462_s5 = sld [smem:[#allocation7 + $0x1]]  ;;  %p1108_p2 = scmp.lt.s32.totalorder %s840_s12, %s1106_s19 }
 0x35c   : > { %v733_v32 = vstv %s1457_s20 }
 0x35e   : > { %719 = vrot.lane.b32.xlu1 %v513_v59, %s1181_s13  ;;  %s1471_s13 = sld [smem:[#allocation7 + $0x2]] }
 0x360   : > { %v608_v35 = vstv %s1462_s5 }
 0x362   : > { %748 = vrot.lane.b32.xlu1 %v513_v59, %s1182_s11  ;;  %s1556_s11 = sld [smem:[#allocation7 + $0x6]] }
 0x364   : > { %v635_v44 = vstv %s1471_s13  ;;  %s825_s13 = scalar_lea.sflag [#allocation5], %s1347_s18 }
 0x366   : > { %775 = vrot.lane.b32.xlu1 %v513_v59, %s1183_s15 }
 0x36a   : > { %782 = vrot.lane.b32.xlu1 %v1391_v52, %s1183_s15  ;;  %s1587_s15 = sld [smem:[#allocation7 + $0x7]] }
 0x394   : > { %v1421_v60 = vpop.permute.xlu0 %629  ;;  %v574_v61 = vpop.permute.xlu1 %573 }
 0x398   : > { %v576_v62 = vpop.permute.xlu1 %575  ;;  %v1423_v63 = vpop.permute.xlu0 %658 }
 0x399   : > { %v578_v33 = vsel %vm570_vm6, %v576_v62, %v574_v61  ;;  %v577_v37 = vsel %vm570_vm6, %v574_v61, %v576_v62 }
 0x39a   : > { %v583_v45 = vmul.f32 %v582_v18, %v578_v33  ;;  %v584_v49 = vmul.f32 %v582_v18, %v577_v37 }
 0x39c   : > { %v1425_v0 = vpop.permute.xlu1 %602  ;;  %v1427_v1 = vpop.permute.xlu0 %697 }
 0x3a0   : > { %v1429_v2 = vpop.permute.xlu1 %604  ;;  %v1433_v4 = vpop.permute.xlu0 %724 }
 0x3a1   : > { %v607_v38 = vsel %vm599_vm7, %v1429_v2, %v1425_v0 }
 0x3a2   : > { %v612_v50 = vmul.f32 %v611_v20, %v607_v38 }
 0x3a4   : > { %v1431_v3 = vpop.permute.xlu1 %631  ;;  %v1437_v6 = vpop.permute.xlu0 %753 }
 0x3a5   : > { %v634_v46 = vsel %vm626_vm8, %v1431_v3, %v1421_v60  ;;  %v633_v51 = vsel %vm626_vm8, %v1421_v60, %v1431_v3  ;;  %v606_v60 = vsel %vm599_vm7, %v1425_v0, %v1429_v2 }
 0x3a6   : > { %v639_v61 = vmul.f32 %v638_v21, %v634_v46  ;;  %v640_v15 = vmul.f32 %v638_v21, %v633_v51 }
 0x3a8   : > { %v1435_v5 = vpop.permute.xlu1 %660  ;;  %v569_v9 = vpop.permute.xlu0 %568 }
 0x3a9   : > { %v662_v17 = vsel %vm655_vm9, %v1423_v63, %v1435_v5 }
 0x3aa   : > { %v669_v37 = vmul.f32 %v667_v28, %v662_v17  ;;  %v759_v17 = vstv %s1587_s15 }
 0x3ac   : > { %v1439_v7 = vpop.permute.xlu1 %699  ;;  %v623_v13 = vpop.permute.xlu0 %622 }
 0x3b0   : > { %v1441_v8 = vpop.permute.xlu1 %726  ;;  %v652_v23 = vpop.permute.xlu0 %651 }
 0x3b4   : > { %v1451_v11 = vpop.permute.xlu1 %755  ;;  %v691_v52 = vpop.permute.xlu0 %690 }
 0x3b8   : > { %v567_v14 = vpop.permute.xlu1 %566  ;;  %v718_v25 = vpop.permute.xlu0 %717 }
 0x3b9   : > { %v572_v27 = vsel %vm570_vm6, %v569_v9, %v567_v14  ;;  %v571_v34 = vsel %vm570_vm6, %v567_v14, %v569_v9  ;;  %v664_v9 = vstv %s1489_s24  ;;  %vm1667_vm6 = vmand %vm1514_vm13, %vm560_vm4  ;;  %s1101_s24 = scalar_lea.vmem %s840_s12, 256 }
 0x3ba   : > { %v580_v39 = vmul.f32 %v579_v26, %v572_v27  ;;  %v581_v47 = vmul.f32 %v579_v26, %v571_v34  ;;  %p1102_p9 = scmp.ne.s32.totalorder %s840_s12, %s1101_s24 }
 0x3bc   : > { %v596_v19 = vpop.permute.xlu1 %595  ;;  %v585_v56 = vadd.f32 %v583_v45, %v580_v39  ;;  %v586_v0 = vadd.f32 %v584_v49, %v581_v47  ;;  %v703_v45 = vstv %s1534_s10  ;;  %p1103_p13 = pnand %p1102_p9, %p1779_p11  ;;  %s1107_s10 = scalar_lea.vmem %s1106_s19, 512 }
 0x3bd   : > { %p1109_p1 = scmp.lt.s32.totalorder %s1107_s10, %s1101_s24 }
 0x3be   : > { %v589_v26 = vsel %vm1551_vm0, %v585_v56, 0.0  ;;  %v730_v56 = vstv %s1556_s11  ;;  %p1104_p10 = pneg %p1103_p13 }
 0x3bf   : > { %v591_v39 = vadd.f32 %v589_v26, %v562_v43  ;;  %p1110_p0 = por %p1109_p1, %p1108_p2 }
 0x3c0   : > { %v598_v36 = vpop.permute.xlu1 %597 }
 0x3c1   : > { %v601_v40 = vsel %vm599_vm7, %v598_v36, %v596_v19  ;;  %v600_v57 = vsel %vm599_vm7, %v596_v19, %v598_v36  ;;  %vm795_vm7 = vmand %vm1566_vm1, %vm560_vm4  ;;  %p1111_p3 = pnand %p1110_p0, %p1104_p10 }
 0x3c2   : > { %v609_v48 = vmul.f32 %v608_v35, %v601_v40  ;;  %v610_v18 = vmul.f32 %v608_v35, %v600_v57  ;;  %v702_v57 = vsel %vm694_vm11, %v1439_v7, %v1427_v1 }
 0x3c4   : > { %v625_v54 = vpop.permute.xlu1 %624  ;;  %v614_v2 = vadd.f32 %v612_v50, %v609_v48 }
 0x3c5   : > { %v627_v58 = vsel %vm626_vm8, %v623_v13, %v625_v54  ;;  %v628_v59 = vsel %vm626_vm8, %v625_v54, %v623_v13  ;;  %v663_v13 = vsel %vm655_vm9, %v1435_v5, %v1423_v63  ;;  %v613_v63 = vmul.f32 %v611_v20, %v606_v60 }
 0x3c6   : > { %v636_v3 = vmul.f32 %v635_v44, %v628_v59  ;;  %v637_v14 = vmul.f32 %v635_v44, %v627_v58  ;;  %v668_v5 = vmul.f32 %v667_v28, %v663_v13  ;;  %v616_v20 = vsel %vm557_vm10, %v614_v2, 0.0 }
 0x3c7   : > { %v615_v40 = vadd.f32 %v613_v63, %v610_v18  ;;  %v701_v28 = vsel %vm694_vm11, %v1427_v1, %v1439_v7  ;;  %v618_v51 = vadd.f32 %v616_v20, %v591_v39  ;;  %v708_v18 = vmul.f32 %v706_v31, %v702_v57 }
 0x3c8   : > { %v654_v24 = vpop.permute.xlu1 %653  ;;  %v641_v27 = vadd.f32 %v639_v61, %v636_v3  ;;  %v642_v38 = vadd.f32 %v640_v15, %v637_v14  ;;  %v747_v61 = vpop.permute.xlu0 %746  ;;  %v757_v39 = vsel %vm750_vm2, %v1437_v6, %v1451_v11 }
 0x3c9   : > { %v656_v21 = vsel %vm655_vm9, %v652_v23, %v654_v24  ;;  %v657_v33 = vsel %vm655_vm9, %v654_v24, %v652_v23  ;;  %v590_v23 = vsel %vm1514_vm13, %v586_v0, 0.0  ;;  %v729_v24 = vsel %vm721_vm15, %v1441_v8, %v1433_v4 }
 0x3ca   : > { %v665_v35 = vmul.f32 %v664_v9, %v657_v33  ;;  %v666_v36 = vmul.f32 %v664_v9, %v656_v21  ;;  %v645_v47 = vsel %vm1583_vm3, %v641_v27, 0.0  ;;  %v592_v50 = vadd.f32 %v590_v23, %v562_v43 }
 0x3cb   : > { %v646_v58 = vsel %vm1566_vm1, %v642_v38, 0.0  ;;  %v707_v43 = vmul.f32 %v706_v31, %v701_v28  ;;  %v647_v1 = vadd.f32 %v645_v47, %v618_v51  ;;  %v762_v21 = vstv %s1593_s16 }
 0x3cc   : > { %v670_v44 = vadd.f32 %v668_v5, %v665_v35  ;;  %v693_v46 = vpop.permute.xlu1 %692  ;;  %v671_v48 = vadd.f32 %v669_v37, %v666_v36  ;;  %v619_v62 = vadd.f32 %v615_v40, %v592_v50  ;;  %v758_v33 = vsel %vm750_vm2, %v1451_v11, %v1437_v6  ;;  %v774_v35 = vpop.permute.xlu0 %773 }
 0x3cd   : > { %v695_v49 = vsel %vm694_vm11, %v691_v52, %v693_v46  ;;  %v696_v54 = vsel %vm694_vm11, %v693_v46, %v691_v52  ;;  %v728_v52 = vsel %vm721_vm15, %v1433_v4, %v1441_v8  ;;  %v735_v8 = vmul.f32 %v733_v32, %v729_v24 }
 0x3ce   : > { %v672_v59 = vsel %vm1510_vm12, %v670_v44, 0.0  ;;  %v704_v60 = vmul.f32 %v703_v45, %v695_v49  ;;  %v673_v3 = vsel %vm1514_vm13, %v671_v48, 0.0  ;;  %v705_v9 = vmul.f32 %v703_v45, %v696_v54 }
 0x3cf   : > { %v648_v2 = vadd.f32 %v646_v58, %v619_v62  ;;  %v674_v14 = vadd.f32 %v672_v59, %v647_v1  ;;  %v734_v26 = vmul.f32 %v733_v32, %v728_v52  ;;  %v764_v20 = vmul.f32 %v762_v21, %v758_v33 }
 0x3d0   : > { %v720_v7 = vpop.permute.xlu1 %719  ;;  %v709_v27 = vadd.f32 %v707_v43, %v704_v60  ;;  %v710_v31 = vadd.f32 %v708_v18, %v705_v9  ;;  %v786_v28 = vstv %s1628_s17  ;;  %v763_v47 = vmul.f32 %v762_v21, %v757_v39  ;;  %v781_v42 = vpop.permute.xlu0 %780 }
 0x3d1   : > { %v722_v13 = vsel %vm721_vm15, %v718_v25, %v720_v7  ;;  %v723_v0 = vsel %vm721_vm15, %v720_v7, %v718_v25  ;;  %v675_v63 = vadd.f32 %v673_v3, %v648_v2  ;;  %v686_v36 = vadd.f32 %v1400_v55, %v674_v14 }
 0x3d2   : > { %v731_v15 = vmul.f32 %v730_v56, %v722_v13  ;;  %v732_v5 = vmul.f32 %v730_v56, %v723_v0  ;;  %v711_v38 = vsel %vm1530_vm14, %v709_v27, 0.0  ;;  %v712_v44 = vsel %vm1566_vm1, %v710_v31, 0.0 }
 0x3d3   : > { %v687_v32 = vadd.f32 %v1482_v22, %v675_v63  ;;  %v713_v46 = vadd.f32 %v711_v38, %v686_v36  ;;  %v789_v50 = vstv %s1638_s25 }
 0x3d4   : > { %v749_v25 = vpop.permute.xlu1 %748  ;;  %v736_v34 = vadd.f32 %v734_v26, %v731_v15  ;;  %v737_v40 = vadd.f32 %v735_v8, %v732_v5  ;;  %v813_v26 = vshrl.u32 %v526_v10, 7 }
 0x3d5   : > { %v752_v4 = vsel %vm750_vm2, %v749_v25, %v747_v61  ;;  %v751_v37 = vsel %vm750_vm2, %v747_v61, %v749_v25  ;;  %v714_v51 = vadd.f32 %v712_v44, %v687_v32 }
 0x3d6   : > { %v761_v23 = vmul.f32 %v759_v17, %v752_v4  ;;  %v740_v6 = vsel %vm1510_vm12, %v736_v34, 0.0  ;;  %v760_v11 = vmul.f32 %v759_v17, %v751_v37  ;;  %v741_v54 = vsel %vm1667_vm6, %v737_v40, 0.0 }
 0x3d7   : > { %v742_v56 = vadd.f32 %v740_v6, %v713_v46  ;;  %v743_v1 = vadd.f32 %v741_v54, %v714_v51  ;;  %v814_v53 = vsub.s32 0, %v813_v26 }
 0x3d8   : > { %v776_v55 = vpop.permute.xlu1 %775  ;;  %v766_v22 = vadd.f32 %v764_v20, %v761_v23  ;;  %v765_v57 = vadd.f32 %v763_v47, %v760_v11 }
 0x3d9   : > { %v778_v48 = vsel %vm777_vm5, %v774_v35, %v776_v55  ;;  %v779_v49 = vsel %vm777_vm5, %v776_v55, %v774_v35 }
 0x3da   : > { %v768_v58 = vsel %vm560_vm4, %v766_v22, 0.0  ;;  %v787_v43 = vmul.f32 %v786_v28, %v778_v48  ;;  %v788_v52 = vmul.f32 %v786_v28, %v779_v49  ;;  %v769_v9 = vadd.f32 %v765_v57, %v742_v56 }
 0x3db   : > { %v770_v13 = vadd.f32 %v768_v58, %v743_v1 }
 0x3dc   : > { %v783_v41 = vpop.permute.xlu1 %782 }
 0x3dd   : > { %v784_v59 = vsel %vm777_vm5, %v781_v42, %v783_v41  ;;  %v785_v60 = vsel %vm777_vm5, %v783_v41, %v781_v42 }
 0x3de   : > { %v790_v61 = vmul.f32 %v789_v50, %v784_v59  ;;  %v791_v62 = vmul.f32 %v789_v50, %v785_v60 }
 0x3e0   : > { %v792_v7 = vadd.f32 %v790_v61, %v787_v43  ;;  %v793_v3 = vadd.f32 %v791_v62, %v788_v52 }
 0x3e2   : > { %v796_v0 = vsel %vm1530_vm14, %v792_v7, 0.0  ;;  %v797_v2 = vsel %vm795_vm7, %v793_v3, 0.0 }
 0x3e3   : > { %v798_v12 = vadd.f32 %v796_v0, %v769_v9  ;;  %v799_v14 = vadd.f32 %v797_v2, %v770_v13 }
 0x3e5   : > { %v953_v15 = vmul.f32 -1.442695, %v798_v12  ;;  %v954_v17 = vmul.f32 -1.442695, %v799_v14 }
 0x3e7   : > { %1050 = vpow2.f32 %v953_v15 }
 0x3e8   : > { %1052 = vpow2.f32 %v954_v17 }
 0x3f4   : > { %v1051_v16 = vpop.eup %1050 }
 0x3f5   : > { %v1053_v18 = vpop.eup %1052  ;;  %v806_v19 = vadd.f32 1.0, %v1051_v16 }
 0x3f6   : > { %v807_v24 = vadd.f32 1.0, %v1053_v18 }
 0x3f7   : > { %1054 = vrcp.f32 %v806_v19 }
 0x3f8   : > { %1056 = vrcp.f32 %v807_v24 }
 0x404   : > { %v1055_v27 = vpop.eup %1054 }
 0x405   : > { %v1057_v21 = vpop.eup %1056  ;;  %v815_v33 = vrot.slane %v1055_v27, %v814_v53 }
 0x406   : > { %v819_v63 = vrot.slane %v1057_v21, %v814_v53 }
 0x407   : > { %v820_v5 = vmul.f32 %v815_v33, %v1373_v29 }
 0x408   : > { %v821_v25 = vmul.f32 %v819_v63, %v1375_v30 }
 0x409   : > { %822 = vst [vmem:[%s309_s23] sm:$0xff] %v820_v5 }
 0x40a   : > { %823 = vst [vmem:[%s309_s23 + $0x8] sm:$0xff] %v821_v25 }
 0x40b   : > { %1114 = shalt.err (!%p1111_p3)
}
 0x40c   : > { %s1115_s11 = scalar_lea.hbm %s1702_s8, 256  ;;  %s1119_s16 = scalar_lea.hbm %s1746_s7, 512 }
 0x40d   : > { %p1116_p12 = scmp.ne.s32.totalorder %s1702_s8, %s1115_s11  ;;  %p1120_p4 = scmp.lt.s32.totalorder %s1702_s8, %s1746_s7 }
 0x40e   : > { %p1121_p6 = scmp.lt.s32.totalorder %s1119_s16, %s1115_s11 }
 0x40f   : > { %p1117_p5 = pnand %p1116_p12, %p1779_p11 }
 0x410   : > { %p1122_p8 = por %p1121_p6, %p1120_p4 }
 0x411   : > { %p1118_p7 = pneg %p1117_p5 }
 0x413   : > { %p1123_p9 = pnand %p1122_p8, %p1118_p7 }
 0x415   : > { %1126 = shalt.err (!%p1123_p9)
}
 0x416   : > { %982 = dma.vmem_to_hbm [thread:$0]  (%p1779_p11), %s840_s12, 256, %s1702_s8, %s825_s13  }
 0x417 PF: > { %s851_s30 = sand.u32 1, %s1157_s26   ;;  %p1780_p13 = scmp.ne.s32.totalorder %s1753_s9, 0 }
 0x418   : > { %p1781_p10 = scmp.ge.s32.totalorder %s1169_s29, 2  ;;  %s852_s23 = scalar_lea.sflag [#allocation5], %s851_s30 }
 0x41a   : > { %p993_p2 = pnand %p1781_p10, %p1780_p13 }
 0x41c   : > { %p994_p1 = pneg %p993_p2 }
 0x41e   : > { %1152 = dma.done.wait (%p994_p1), %s852_s23, 256  }
 0x41f   : > { %1154 = vsyncadd (%p994_p1), %s852_s23, 4294967040  ;;  %p22_p0 = scmp.ge.s32.totalorder %s1279_s14, 4   ;;  %s1782_s26 = smov %s1161_s27 }
 0x420   : > { %s1783_s27 = smov %s1165_s28  ;;  %s1784_s28 = smov %s1303_s21 }
 0x421   : > { %s1785_s29 = smov %s1279_s14  ;;  %24 = sbr.rel (!%p22_p0) target bundleno = 9 (0x9), region = 98 }
 0x426   :  { %857 = vsyncpa [#allocation4], 1 }
 0x427   :  { %859 = vsyncpa [#allocation4 + $0x1], 1 }
 0x428   :  { %860 = vsyncpa [#allocation5], 1 }
 0x429   :  { %862 = vsyncpa [#allocation5 + $0x1], 1 }
 0x42a   :  { %863 = vsyncpa [#allocation6], 1 }
 0x42b   :  { %865 = vsyncpa [#allocation6 + $0x1], 1 }

</bundles_post_ra>
